<compile_context>
chip_gen: v7x
topology: tpu7x:2x2x1
jax: 0.10.0
libtpu: 0.0.40
codegen_flags: <defaults>
</compile_context>

<pallas_src>
import functools

import jax
import jax.numpy as jnp
from jax.experimental import pallas as pl
from jax.experimental.pallas import tpu as pltpu

_LANE = 128
_REDUCE_CHUNK = 4 * _LANE      # lanes per in-kernel reduction chunk (f32 temp size)


def _round_up(x, m):
    return (x + m - 1) // m * m


def _cdiv(a, b):
    return -(-a // b)


def _vmem_capacity_bytes():
    """Per-core VMEM capacity; conservative fallback (v7x = 64 MiB/TC)."""
    try:
        info = pltpu.get_tpu_info()
        cap = int(getattr(info, "vmem_capacity_bytes", 0))
        if (16 << 20) <= cap <= (256 << 20):
            return cap
    except Exception:
        pass
    return 64 << 20


def _tensorcores_per_chip():
    """Best-effort TC-per-chip query (v7x has 2); safe default is 1."""
    try:
        return max(1, min(2, int(getattr(jax.devices()[0], "num_cores", 1))))
    except Exception:
        return 1


def _gate_from_sums(sums, params, *, mode, epsilon):
    """sums: (C, 1) f32 spatial sums (x^2 for l2; |x| or x for l1) -> (C, 1) gate."""
    alpha = params[:, 0:1]
    gamma = params[:, 1:2]
    beta = params[:, 2:3]
    if mode == "l2":
        embedding = jnp.sqrt(sums + epsilon) * alpha                      # (C, 1)
        mean_c = jnp.mean(embedding * embedding, axis=0, keepdims=True)   # (1, 1)
        norm = gamma * jax.lax.rsqrt(mean_c + epsilon)                    # EUP rsqrt
    else:  # l1
        embedding = sums * alpha                                          # (C, 1)
        mean_c = jnp.mean(jnp.abs(embedding), axis=0, keepdims=True)      # (1, 1)
        # exact reciprocal on a single (1,1) scalar, far off the critical path
        norm = gamma * pl.reciprocal(mean_c + epsilon, approx=False)
    return 1.0 + jnp.tanh(embedding * norm + beta)                        # (C, 1)


def _accumulate_spatial_sums(x_ref, acc_ref, *, hw_start, hw_total, chunk,
                             mode, after_relu, need_mask):
    """acc_ref (C,1) f32 += spatial sum over the lane axis of x_ref's (C, W) view.

    The view is processed as full `chunk`-lane pieces plus a static ragged tail,
    so only one small (C, chunk) f32 temporary is live at a time and no
    out-of-bounds VMEM reads ever happen.  When `need_mask` is set, lanes at or
    past `hw_total` (garbage lanes of a ragged edge *block*) are masked out.
    """
    C, width_total = x_ref.shape
    n_chunks = width_total // chunk
    tail = width_total % chunk

    def accumulate(start, width):
        xc = x_ref[:, pl.ds(start, width)].astype(jnp.float32)    # (C, width) f32
        if need_mask:
            lane = jax.lax.broadcasted_iota(jnp.int32, (C, width), 1)
            valid = hw_total - (hw_start + start)                  # scalar
            xc = jnp.where(lane < valid, xc, 0.0)
        if mode == "l2":
            part = jnp.sum(xc * xc, axis=-1, keepdims=True)
        else:
            xa = xc if after_relu else jnp.abs(xc)
            part = jnp.sum(xa, axis=-1, keepdims=True)
        acc_ref[...] += part

    if n_chunks == 1:
        accumulate(0, chunk)
    elif n_chunks > 1:
        @pl.loop(0, n_chunks)
        def _(i):
            accumulate(pl.multiple_of(i * chunk, chunk), chunk)
    if tail:
        accumulate(n_chunks * chunk, tail)


def _gct_full_kernel(x_ref, params_ref, o_ref, sums_ref, *, hw_total, chunk,
                     mode, after_relu, epsilon):
    """Path A: one grid step == one batch element.  x_ref view: (C, HW)."""
    sums_ref[...] = jnp.zeros_like(sums_ref)
    # Chunked reduce: no full-slab f32 temporary is ever materialized.
    _accumulate_spatial_sums(x_ref, sums_ref, hw_start=0, hw_total=hw_total,
                             chunk=chunk, mode=mode, after_relu=after_relu,
                             need_mask=False)
    gate = _gate_from_sums(sums_ref[...], params_ref[...], mode=mode,
                           epsilon=epsilon)                        # (C, 1) f32
    # Wide multiply in the input dtype (gate is in [0, 2]; exact for f32 inputs,
    # tiny precision delta for bf16 — avoids a second full-slab f32 temporary).
    o_ref[...] = x_ref[...] * gate.astype(o_ref.dtype)


def _gct_reduce_kernel(x_ref, params_ref, gate_ref, *, hw_total, hw_tile, chunk,
                       mode, after_relu, epsilon, need_mask):
    """Path B pass 1: grid=(B, n_hw).  gate_ref (C,1) is the revisited
    accumulator across the HW axis; finalized into the gate on the last tile."""
    h = pl.program_id(1)

    @pl.when(h == 0)
    def _():
        gate_ref[...] = jnp.zeros_like(gate_ref)

    _accumulate_spatial_sums(x_ref, gate_ref, hw_start=h * hw_tile,
                             hw_total=hw_total, chunk=chunk, mode=mode,
                             after_relu=after_relu, need_mask=need_mask)

    @pl.when(h == pl.num_programs(1) - 1)
    def _():
        gate_ref[...] = _gate_from_sums(gate_ref[...], params_ref[...],
                                        mode=mode, epsilon=epsilon)


def _gct_apply_kernel(x_ref, gate_ref, o_ref):
    """Path B pass 2: o = x * gate, fully parallel over (B, n_hw).
    Ragged edge blocks are handled by the pipeline's masked output store."""
    o_ref[...] = x_ref[...] * gate_ref[...].astype(o_ref.dtype)


def gct_forward(x, alpha, gamma, beta, *, mode="l2", after_relu=False,
                epsilon=1e-5, max_vmem_bytes=None, tensorcores_per_chip=None):
    """x: (B, C, H, W) NCHW; alpha/gamma/beta: (1, C, 1, 1).  Returns (B, C, H, W)."""
    if mode not in ("l2", "l1"):
        raise ValueError("Unknown mode!")

    B, C, H, W = x.shape
    HW = H * W
    itemsize = jnp.dtype(x.dtype).itemsize
    sublane = max(8, 32 // itemsize)            # sublane pack: 8 f32 / 16 bf16
    C_pad = _round_up(C, sublane)
    hw_pad = _round_up(HW, _LANE)

    # Fused per-channel params: one (C, 3) f32 tile, one BlockSpec, one DMA.
    params = jnp.concatenate(
        [alpha.reshape(C, 1), gamma.reshape(C, 1), beta.reshape(C, 1)],
        axis=1).astype(jnp.float32)

    # Free view (no data movement, no host-side pad): NCHW -> (B, C, HW).
    x2 = x.reshape(B, C, HW)

    # Generation-aware VMEM sizing: 75% of queried capacity as the working cap
    # (~48 MiB on v7x's 64 MiB/TC, ~96 MiB on v5e/v6e's 128 MiB).
    hw_cap = (_vmem_capacity_bytes() * 3) // 4
    budget = hw_cap if max_vmem_bytes is None else min(hw_cap, int(max_vmem_bytes))

    def _limit(footprint):
        return int(min(hw_cap, max(footprint, 8 << 20)))

    # In-kernel reduction chunk (bounds the f32 temporary to (C, chunk)).
    chunk = min(_REDUCE_CHUNK, hw_pad)

    # ----- Path A sizing: one full (C, HW) slab per batch element ------------
    slab_pad_bytes = C_pad * hw_pad * itemsize
    # 2x double-buffered input + 2x double-buffered output + chunk f32 temps.
    path_a_footprint = 4 * slab_pad_bytes + 2 * C_pad * chunk * 4 + (1 << 20)
    use_path_a = path_a_footprint <= budget

    # On a 2-TensorCore chip (v7x), Path A's grid=(B,) leaves one core idle when
    # B == 1; Path B's apply pass is parallel over (B, n_hw), so trade 1.5x HBM
    # traffic for 2x core coverage when there is enough spatial work to split.
    tcs = (_tensorcores_per_chip() if tensorcores_per_chip is None
           else max(1, int(tensorcores_per_chip)))
    force_hw_split = None
    if use_path_a and B == 1 and tcs > 1 and HW >= 4 * chunk:
        use_path_a = False
        force_hw_split = tcs

    if use_path_a:
        # ---------------- Path A: fused single-pass kernel --------------------
        kernel = functools.partial(
            _gct_full_kernel, hw_total=HW, chunk=chunk, mode=mode,
            after_relu=after_relu, epsilon=epsilon)
        out = pl.pallas_call(
            kernel,
            out_shape=jax.ShapeDtypeStruct((B, C, HW), x.dtype),
            grid_spec=pltpu.PrefetchScalarGridSpec(
                num_scalar_prefetch=0,
                grid=(B,),
                in_specs=[
                    pl.BlockSpec((pl.Squeezed(), C, HW), lambda b: (b, 0, 0)),
                    pl.BlockSpec((C, 3), lambda b: (0, 0)),
                ],
                out_specs=pl.BlockSpec((pl.Squeezed(), C, HW),
                                       lambda b: (b, 0, 0)),
                scratch_shapes=[pltpu.VMEM((C, 1), jnp.float32)],
            ),
            compiler_params=pltpu.CompilerParams(
                dimension_semantics=("parallel",),
                vmem_limit_bytes=_limit(path_a_footprint + (2 << 20))),
        )(x2, params)
    else:
        # ---------------- Path B: HW-tiled two-pass structure ------------------
        def _tile_hw(max_lanes):
            tile = max(_LANE, (max_lanes // _LANE) * _LANE)
            if force_hw_split is not None:
                tile = min(tile, _round_up(_cdiv(HW, force_hw_split), _LANE))
            if tile >= HW:                      # single full-width (ragged) block
                return HW, 1, False
            n = _cdiv(HW, tile)
            return tile, n, (n * tile != HW)

        # Pass 1 (reduce): footprint ~ 2x double-buffered input tile + chunk
        # f32 temps + (C,1) accumulator + params.
        red_overhead = 2 * C_pad * chunk * 4 + (1 << 20)
        max_red_lanes = max(0, budget - red_overhead) // (2 * C_pad * itemsize)
        hw_tile_r, n_hw_r, need_mask_r = _tile_hw(max_red_lanes)
        vmem_limit_r = _limit(2 * C_pad * _round_up(hw_tile_r, _LANE) * itemsize
                              + red_overhead + (2 << 20))

        reduce_kernel = functools.partial(
            _gct_reduce_kernel, hw_total=HW, hw_tile=hw_tile_r, chunk=chunk,
            mode=mode, after_relu=after_relu, epsilon=epsilon,
            need_mask=need_mask_r)
        gate = pl.pallas_call(
            reduce_kernel,
            out_shape=jax.ShapeDtypeStruct((B, C, 1), jnp.float32),
            grid_spec=pltpu.PrefetchScalarGridSpec(
                num_scalar_prefetch=0,
                grid=(B, n_hw_r),
                in_specs=[
                    pl.BlockSpec((pl.Squeezed(), C, hw_tile_r),
                                 lambda b, h: (b, 0, h)),
                    pl.BlockSpec((C, 3), lambda b, h: (0, 0)),
                ],
                out_specs=pl.BlockSpec((pl.Squeezed(), C, 1),
                                       lambda b, h: (b, 0, 0)),
            ),
            compiler_params=pltpu.CompilerParams(
                dimension_semantics=("parallel", "arbitrary"),
                vmem_limit_bytes=vmem_limit_r),
        )(x2, params)

        # Pass 2 (apply): no f32 temporary, so it gets its own (larger) tile.
        # Footprint ~ 2x in + 2x out double-buffered tiles + tiny gate block.
        max_app_lanes = max(0, budget - (1 << 20)) // (4 * C_pad * itemsize)
        hw_tile_a, n_hw_a, _ = _tile_hw(max_app_lanes)
        vmem_limit_a = _limit(4 * C_pad * _round_up(hw_tile_a, _LANE) * itemsize
                              + (3 << 20))

        out = pl.pallas_call(
            _gct_apply_kernel,
            out_shape=jax.ShapeDtypeStruct((B, C, HW), x.dtype),
            grid_spec=pltpu.PrefetchScalarGridSpec(
                num_scalar_prefetch=0,
                grid=(B, n_hw_a),
                in_specs=[
                    pl.BlockSpec((pl.Squeezed(), C, hw_tile_a),
                                 lambda b, h: (b, 0, h)),
                    pl.BlockSpec((pl.Squeezed(), C, 1), lambda b, h: (b, 0, 0)),
                ],
                out_specs=pl.BlockSpec((pl.Squeezed(), C, hw_tile_a),
                                       lambda b, h: (b, 0, h)),
            ),
            compiler_params=pltpu.CompilerParams(
                dimension_semantics=("parallel", "parallel"),
                vmem_limit_bytes=vmem_limit_a),
        )(x2, gate)

    return out.reshape(B, C, H, W)


def _gct_reference(x, alpha, gamma, beta, *, mode="l2", after_relu=False,
                   epsilon=1e-5):
    if mode == "l2":
        emb = jnp.sqrt(jnp.sum(x * x, axis=(2, 3), keepdims=True) + epsilon) * alpha
        norm = gamma / jnp.sqrt(jnp.mean(emb * emb, axis=1, keepdims=True) + epsilon)
    else:  # l1
        xa = x if after_relu else jnp.abs(x)
        emb = jnp.sum(xa, axis=(2, 3), keepdims=True) * alpha
        norm = gamma / (jnp.mean(jnp.abs(emb), axis=1, keepdims=True) + epsilon)
    gate = 1.0 + jnp.tanh(emb * norm + beta)
    return x * gate


if __name__ == "__main__":
    key = jax.random.PRNGKey(0)
    kx, ka, kg, kb = jax.random.split(key, 4)

    B, C = 2, 4
    # Module defaults (alpha=1, gamma=0, beta=0) give gate == 1; perturb so the
    # full compute path is exercised.
    alpha = 1.0 + 0.1 * jax.random.normal(ka, (1, C, 1, 1), dtype=jnp.float32)
    gamma = 0.1 * jax.random.normal(kg, (1, C, 1, 1), dtype=jnp.float32)
    beta = 0.05 * jax.random.normal(kb, (1, C, 1, 1), dtype=jnp.float32)

    # 1) l2, lane-aligned spatial size -> Path A (single fused kernel per batch).
    x = jax.random.normal(kx, (B, C, 16, 16), dtype=jnp.float32)
    out = gct_forward(x, alpha, gamma, beta, mode="l2")
    jax.block_until_ready(out)
    ref = _gct_reference(x, alpha, gamma, beta, mode="l2")
    assert out.shape == x.shape
    assert jnp.allclose(out, ref, atol=1e-5, rtol=1e-5), "l2 Path A mismatch"

    # 2) l2, larger ragged spatial size -> Path A with chunked (pl.loop) reduce.
    x_big = jax.random.normal(kx, (B, C, 40, 40), dtype=jnp.float32)
    out_big = gct_forward(x_big, alpha, gamma, beta, mode="l2")
    jax.block_until_ready(out_big)
    ref_big = _gct_reference(x_big, alpha, gamma, beta, mode="l2")
    assert jnp.allclose(out_big, ref_big, atol=1e-5, rtol=1e-5), "l2 chunked mismatch"

    # 3) l2, forced two-pass HW-tiled Path B with ragged edge tiles (exercises
    #    the in-kernel reduction masking and masked edge output stores).
    x_rag = jax.random.normal(kx, (B, C, 25, 25), dtype=jnp.float32)
    out_rag = gct_forward(x_rag, alpha, gamma, beta, mode="l2",
                          max_vmem_bytes=16 * 1024)
    jax.block_until_ready(out_rag)
    ref_rag = _gct_reference(x_rag, alpha, gamma, beta, mode="l2")
    assert jnp.allclose(out_rag, ref_rag, atol=1e-5, rtol=1e-5), "l2 Path B mismatch"

    # 4) l1 mode with a non-128-multiple spatial size (in-kernel ragged handling).
    x_odd = jax.random.normal(kx, (B, C, 10, 10), dtype=jnp.float32)
    out_l1 = gct_forward(x_odd, alpha, gamma, beta, mode="l1", after_relu=False)
    jax.block_until_ready(out_l1)
    ref_l1 = _gct_reference(x_odd, alpha, gamma, beta, mode="l1", after_relu=False)
    assert jnp.allclose(out_l1, ref_l1, atol=1e-5, rtol=1e-5), "l1 mismatch"

    # 5) l1 with after_relu=True on a ReLU'd input.
    x_relu = jnp.maximum(x_odd, 0.0)
    out_r = gct_forward(x_relu, alpha, gamma, beta, mode="l1", after_relu=True)
    jax.block_until_ready(out_r)
    ref_r = _gct_reference(x_relu, alpha, gamma, beta, mode="l1", after_relu=True)
    assert jnp.allclose(out_r, ref_r, atol=1e-5, rtol=1e-5), "l1 after_relu mismatch"

    print("KERNEL_OK")
</pallas_src>

<mosaic_0001>
module attributes {stable_mosaic.version = 11 : i64} {
  func.func @_gct_full_kernel(%arg0: i32, %arg1: memref<1x4x256xf32, #tpu.memory_space<vmem>>, %arg2: memref<4x3xf32, #tpu.memory_space<vmem>>, %arg3: memref<1x4x256xf32, #tpu.memory_space<vmem>>, %arg4: memref<4x1xf32, #tpu.memory_space<vmem>>) attributes {dimension_semantics = [#tpu.dimension_semantics<parallel>], iteration_bounds = array<i64: 2>, scalar_prefetch = 0 : i64, scratch_operands = 1 : i64, tpu.core_type = #tpu.core_type<tc>, window_params = [{transform_indices = @transform_0, window_bounds = array<i64: 1, 4, 256>}, {pipeline_mode = #tpu.pipeline_mode<synchronous>, transform_indices = @transform_1, window_bounds = array<i64: 4, 3>}, {transform_indices = @transform_2, window_bounds = array<i64: 1, 4, 256>}]} {
    %cst = arith.constant 0.000000e+00 : f32
    %0 = vector.broadcast %cst : f32 to vector<4x1xf32>
    %c0 = arith.constant 0 : index
    %c0_0 = arith.constant 0 : index
    %1 = vector.load %arg4[%c0, %c0_0] : memref<4x1xf32, #tpu.memory_space<vmem>>, vector<4x1xf32>
    tpu.vector_store %arg4[%c0, %c0_0], %0 {strides = array<i32>} : memref<4x1xf32, #tpu.memory_space<vmem>>, vector<4x1xf32>,
    %c0_1 = arith.constant 0 : index
    %c0_2 = arith.constant 0 : index
    %c0_3 = arith.constant 0 : index
    %2 = vector.load %arg1[%c0_1, %c0_2, %c0_3] : memref<1x4x256xf32, #tpu.memory_space<vmem>>, vector<1x4x256xf32>
    %3 = vector.shape_cast %2 : vector<1x4x256xf32> to vector<4x256xf32>
    %4 = arith.mulf %3, %3 : vector<4x256xf32>
    %cst_4 = arith.constant dense<0.000000e+00> : vector<4xf32>
    %5 = vector.multi_reduction <add>, %4, %cst_4 [1] : vector<4x256xf32> to vector<4xf32>
    %6 = vector.shape_cast %5 : vector<4xf32> to vector<4x1xf32>
    %c0_5 = arith.constant 0 : index
    %c0_6 = arith.constant 0 : index
    %7 = vector.load %arg4[%c0_5, %c0_6] : memref<4x1xf32, #tpu.memory_space<vmem>>, vector<4x1xf32>
    %8 = arith.addf %7, %6 : vector<4x1xf32>
    %c0_7 = arith.constant 0 : index
    %c0_8 = arith.constant 0 : index
    %9 = vector.load %arg4[%c0_7, %c0_8] : memref<4x1xf32, #tpu.memory_space<vmem>>, vector<4x1xf32>
    tpu.vector_store %arg4[%c0_7, %c0_8], %8 {strides = array<i32>} : memref<4x1xf32, #tpu.memory_space<vmem>>, vector<4x1xf32>,
    %c0_9 = arith.constant 0 : index
    %c0_10 = arith.constant 0 : index
    %10 = vector.load %arg4[%c0_9, %c0_10] : memref<4x1xf32, #tpu.memory_space<vmem>>, vector<4x1xf32>
    %c0_11 = arith.constant 0 : index
    %c0_12 = arith.constant 0 : index
    %11 = vector.load %arg2[%c0_11, %c0_12] : memref<4x3xf32, #tpu.memory_space<vmem>>, vector<4x3xf32>
    %12 = vector.extract_strided_slice %11 {offsets = [0, 0], sizes = [4, 1], strides = [1, 1]} : vector<4x3xf32> to vector<4x1xf32>
    %13 = vector.extract_strided_slice %11 {offsets = [0, 1], sizes = [4, 1], strides = [1, 1]} : vector<4x3xf32> to vector<4x1xf32>
    %14 = vector.extract_strided_slice %11 {offsets = [0, 2], sizes = [4, 1], strides = [1, 1]} : vector<4x3xf32> to vector<4x1xf32>
    %cst_13 = arith.constant 9.99999974E-6 : f32
    %15 = vector.broadcast %cst_13 : f32 to vector<4x1xf32>
    %16 = arith.addf %10, %15 : vector<4x1xf32>
    %17 = math.sqrt %16 : vector<4x1xf32>
    %18 = arith.mulf %17, %12 : vector<4x1xf32>
    %19 = arith.mulf %18, %18 : vector<4x1xf32>
    %cst_14 = arith.constant dense<0.000000e+00> : vector<1xf32>
    %20 = vector.multi_reduction <add>, %19, %cst_14 [0] : vector<4x1xf32> to vector<1xf32>
    %21 = vector.shape_cast %20 : vector<1xf32> to vector<1x1xf32>
    %cst_15 = arith.constant 4.000000e+00 : f32
    %22 = vector.broadcast %cst_15 : f32 to vector<1x1xf32>
    %23 = arith.divf %21, %22 : vector<1x1xf32>
    %cst_16 = arith.constant 9.99999974E-6 : f32
    %24 = vector.broadcast %cst_16 : f32 to vector<1x1xf32>
    %25 = arith.addf %23, %24 : vector<1x1xf32>
    %26 = math.rsqrt %25 : vector<1x1xf32>
    %27 = vector.broadcast %26 : vector<1x1xf32> to vector<4x1xf32>
    %28 = arith.mulf %13, %27 : vector<4x1xf32>
    %29 = arith.mulf %18, %28 : vector<4x1xf32>
    %30 = arith.addf %29, %14 : vector<4x1xf32>
    %31 = math.tanh %30 : vector<4x1xf32>
    %cst_17 = arith.constant 1.000000e+00 : f32
    %32 = vector.broadcast %cst_17 : f32 to vector<4x1xf32>
    %33 = arith.addf %32, %31 : vector<4x1xf32>
    %c0_18 = arith.constant 0 : index
    %c0_19 = arith.constant 0 : index
    %c0_20 = arith.constant 0 : index
    %34 = vector.load %arg1[%c0_18, %c0_19, %c0_20] : memref<1x4x256xf32, #tpu.memory_space<vmem>>, vector<1x4x256xf32>
    %35 = vector.shape_cast %34 : vector<1x4x256xf32> to vector<4x256xf32>
    %36 = vector.broadcast %33 : vector<4x1xf32> to vector<4x256xf32>
    %37 = arith.mulf %35, %36 : vector<4x256xf32>
    %c0_21 = arith.constant 0 : index
    %c0_22 = arith.constant 0 : index
    %c0_23 = arith.constant 0 : index
    %38 = vector.load %arg3[%c0_21, %c0_22, %c0_23] : memref<1x4x256xf32, #tpu.memory_space<vmem>>, vector<1x4x256xf32>
    %39 = vector.shape_cast %38 : vector<1x4x256xf32> to vector<4x256xf32>
    %40 = vector.shape_cast %37 : vector<4x256xf32> to vector<1x4x256xf32>
    tpu.vector_store %arg3[%c0_21, %c0_22, %c0_23], %40 {strides = array<i32>} : memref<1x4x256xf32, #tpu.memory_space<vmem>>, vector<1x4x256xf32>,
    return
  }
  func.func @transform_0(%arg0: i32) -> (i32, i32, i32) {
    %c0_i32 = arith.constant 0 : i32
    %c0_i32_0 = arith.constant 0 : i32
    %c0_i32_1 = arith.constant 0 : i32
    return %arg0, %c0_i32, %c0_i32_0 : i32, i32, i32
  }
  func.func @transform_1(%arg0: i32) -> (i32, i32) {
    %c0_i32 = arith.constant 0 : i32
    %c0_i32_0 = arith.constant 0 : i32
    %c0_i32_1 = arith.constant 0 : i32
    return %c0_i32, %c0_i32_0 : i32, i32
  }
  func.func @transform_2(%arg0: i32) -> (i32, i32, i32) {
    %c0_i32 = arith.constant 0 : i32
    %c0_i32_0 = arith.constant 0 : i32
    %c0_i32_1 = arith.constant 0 : i32
    return %arg0, %c0_i32, %c0_i32_0 : i32, i32, i32
  }
}

</mosaic_0001>

<bundles_post_ra>
// kernel: tpu_custom_call.1
= control target key start
LH: loop header
LB: loop body
LE: loop exit
PB: predicated region body
PF: predicated region fallthrough
CT: control target
= control target key end

     0   :  { %7 = vsyncpa [#allocation4], 0  ;;  %s795_s0 = inlined_call_operand.hbm [shape: f32[2,4,256], index: 0, kind: input, shape index: {}]   ;;  %s796_s1 = inlined_call_operand.hbm [shape: f32[4,3], index: 1, kind: input, shape index: {}]   ;;  %s797_s2 = inlined_call_operand.hbm [shape: f32[2,4,256], index: 2, kind: output, shape index: {}]  }
   0x1   :  { %9 = vsyncpa [#allocation4 + $0x1], 0 }
   0x2   :  { %10 = vsyncpa [#allocation7], 0 }
   0x3   :  { %11 = vsyncpa [#allocation5], 0 }
   0x4   :  { %13 = vsyncpa [#allocation5 + $0x1], 0  ;;  %s582_s9 = smov 0   ;;  %s584_s10 = smov 0  }
   0x5   :  { %s586_s11 = smov 0   ;;  %s588_s12 = smov 0  }
   0x6 LB: > { %s603_s13 = sadd.s32 4294967295, %s556_s12   ;;  %s339_s14 = sadd.s32 4294967294, %s556_s12   ;;  %s556_s12 = sphi %s588_s12, %s821_s12   ;;  %s552_s11 = sphi %s586_s11, %s820_s11   ;;  %s548_s10 = sphi %s584_s10, %s819_s10   ;;  %s544_s9 = sphi %s582_s9, %s818_s9  }
   0x7   : > { %p39_p0 = scmp.ne.s32.totalorder %s548_s10, %s544_s9  ;;  %p798_p1 = scmp.eq.s32.totalorder %s603_s13, 0 }
   0x8   : > { %p90_p3 = scmp.eq.s32.totalorder %s339_s14, 1  ;;  %p340_p5 = scmp.ge.s32.totalorder %s556_s12, 1 }
   0x9   : > { %p612_p4 = por %p798_p1, %p39_p0  ;;  %p97_p7 = scmp.lt.s32.totalorder %s556_s12, 3 }
   0xa   : > { %p617_p6 = por %p90_p3, %p39_p0  ;;  %s558_s18 = smov [#allocation6]  }
   0xb   : > { %s801_s15 = scalar_select %p612_p4, 1, 0 }
   0xc   : > { %s802_s16 = scalar_select %p617_p6, 1, 0 }
   0xd   : > { %p622_p8 = pnand %p340_p5, %p97_p7  ;;  %s110_s19 = sshll.u32 %s558_s18, 4  ;;  %s111_s19 = int_to_ptr.vmem [resolvable:$true] %s110_s19 }
   0xe   : > { %s630_s20 = sadd.s32 1, %s556_s12   ;;  %s26_s24 = sadd.s32 1, %s552_s11 }
   0xf   : > { %s803_s17 = scalar_select %p622_p8, 1, 0 }
  0x10   : > { %p365_p10 = pneg %p622_p8  ;;  %s23_s22 = ssub.s32 %s556_s12, %s630_s20 }
  0x11   : > { %p640_p12 = scmp.eq.s32.totalorder %s23_s22, 0  ;;  %s428_s27 = scalar_lea.hbm %s796_s1, 64 }
  0x12   : > { %p634_p11 = pnand %p365_p10, %p798_p1  ;;  %p429_p0 = scmp.ne.s32.totalorder %s796_s1, %s428_s27 }
  0x13   : > { %s805_s23 = scalar_select %p640_p12, 1, 0 }
  0x14   : > { %p430_p3 = pneg %p634_p11  ;;  %p435_p10 = scmp.lt.u32.totalorder %s428_s27, %s796_s1 }
  0x16   : > { %p431_p5 = pnand %p430_p3, %p429_p0 }
  0x18   : > { %p432_p7 = pneg %p431_p5 }
  0x1a   : > { %p437_p9 = pnand %p435_p10, %p432_p7 }
  0x1c   : > { %440 = shalt.err (!%p437_p9)
}
  0x1d   : > { %s441_s4 = scalar_lea.vmem %s111_s19, 64  ;;  %p449_p6 = scmp.lt.s32.totalorder %s111_s19, %s111_s19 }
  0x1e   : > { %p442_p1 = scmp.ne.s32.totalorder %s111_s19, %s441_s4  ;;  %p450_p4 = scmp.lt.s32.totalorder %s441_s4, %s441_s4 }
  0x20   : > { %p444_p2 = pnand %p442_p1, %p430_p3  ;;  %p451_p8 = por %p450_p4, %p449_p6 }
  0x22   : > { %p445_p13 = pneg %p444_p2 }
  0x24   : > { %p452_p12 = pnand %p451_p8, %p445_p13 }
  0x26   : > { %455 = shalt.err (!%p452_p12)
}
  0x27   : > { %368 = dma.hbm_to_vmem [thread:$0]  (!%p634_p11), %s796_s1, 64, %s111_s19, [#allocation7]  }
  0x28   : > { %p806_p1 = scmp.ne.s32.totalorder %s805_s23, 0  ;;  %p34_p2 = scmp.eq.s32.totalorder %s556_s12, 0 }
  0x29   : > { %p807_p4 = scmp.ne.s32.totalorder %s552_s11, %s548_s10  ;;  %p808_p6 = scmp.eq.s32.totalorder %s603_s13, 1 }
  0x2a   : > { %s666_s7 = scalar_select %p806_p1, %s552_s11, %s26_s24  }
  0x2b   : > { %p674_p8 = por %p808_p6, %p807_p4  ;;  %p378_p9 = scmp.lt.s32.totalorder %s556_s12, 2 }
  0x2c   : > { %s121_s14 = sand.u32 1, %s552_s11   ;;  %p810_p12 = pmov %p807_p4 }
  0x2d   : > { %s343_s18 = sshll.u32 %s121_s14, 3  ;;  %s355_s21 = sshll.u32 %s556_s12, 7 }
  0x2e   : > { %p35_p13 = por %p34_p2, %p810_p12  ;;  %s687_s19 = scalar_lea.hbm %s795_s0, %s355_s21 }
  0x2f   : > { %s125_s23 = scalar_lea.vmem [#allocation3], %s343_s18  ;;  %s122_s27 = scalar_lea.sflag [#allocation4], %s121_s14 }
  0x30   : > { %s133_s24 = sshll.u32 %s125_s23, 4  ;;  %p689_p11 = pnand %p378_p9, %p35_p13  ;;  %s693_s24 = int_to_ptr.vmem [resolvable:$true] %s133_s24 }
  0x31   : > { %s456_s28 = scalar_lea.hbm %s687_s19, 128  ;;  %s461_s3 = scalar_lea.hbm %s795_s0, 256 }
  0x32   : > { %p457_p0 = scmp.ne.s32.totalorder %s687_s19, %s456_s28  ;;  %p458_p3 = pneg %p689_p11 }
  0x33   : > { %p462_p10 = scmp.lt.u32.totalorder %s687_s19, %s795_s0  ;;  %p463_p1 = scmp.lt.u32.totalorder %s461_s3, %s456_s28 }
  0x34   : > { %p459_p5 = pnand %p458_p3, %p457_p0  ;;  %p465_p4 = scmp.lt.u32.totalorder %s456_s28, %s687_s19 }
  0x35   : > { %p464_p2 = por %p463_p1, %p462_p10 }
  0x36   : > { %p460_p7 = pneg %p459_p5 }
  0x37   : > { %p466_p6 = por %p465_p4, %p464_p2 }
  0x39   : > { %p467_p9 = pnand %p466_p6, %p460_p7 }
  0x3b   : > { %470 = shalt.err (!%p467_p9)
}
  0x3c   : > { %s471_s6 = scalar_lea.vmem %s693_s24, 128  ;;  %s559_s14 = smov [#allocation3]  }
  0x3d   : > { %p472_p12 = scmp.ne.s32.totalorder %s693_s24, %s471_s6  ;;  %s476_s18 = sshll.u32 %s559_s14, 4  ;;  %s477_s18 = int_to_ptr.vmem [resolvable:$false] %s476_s18 }
  0x3e   : > { %s478_s21 = scalar_lea.vmem %s477_s18, 256  ;;  %p479_p5 = scmp.lt.s32.totalorder %s693_s24, %s477_s18 }
  0x3f   : > { %p474_p13 = pnand %p472_p12, %p458_p3  ;;  %p480_p10 = scmp.lt.s32.totalorder %s478_s21, %s471_s6 }
  0x41   : > { %p475_p0 = pneg %p474_p13  ;;  %p481_p1 = por %p480_p10, %p479_p5 }
  0x43   : > { %p482_p2 = pnand %p481_p1, %p475_p0 }
  0x45   : > { %485 = shalt.err (!%p482_p2)
}
  0x46   : > { %372 = dma.hbm_to_vmem [thread:$0]  (!%p689_p11), %s687_s19, 128, %s693_s24, %s122_s27  }
  0x47   : > { %p812_p7 = scmp.ne.s32.totalorder %s803_s17, 0 }
  0x48   : > { %s723_s22 = sand.u32 (!%p812_p7), 1, %s548_s10   ;;  %p813_p3 = scmp.ne.s32.totalorder (!%p812_p7), %s801_s15, 0 }
  0x49   : > { %142 = sbr.rel (%p812_p7) target bundleno = 690 (0x2b2), region = 28  ;;  %s347_s25 = sshll.u32 (!%p812_p7), %s723_s22, 3 }
  0x4a   : > { %s145_s23 = scalar_lea.sflag (!%p812_p7), [#allocation4], %s723_s22  ;;  %s148_s28 = scalar_lea.vmem (!%p812_p7), [#allocation3], %s347_s25 }
  0x50   : > { %531 = dma.done.wait (%p813_p3), %s145_s23, 128  }
  0x51   : > { %533 = vsyncadd (%p813_p3), %s145_s23, 4294967168  ;;  %p814_p11 = scmp.eq.s32.totalorder %s603_s13, 0 }
  0x53   : > { %535 = dma.done.wait (%p814_p11), [#allocation7], 64   ;;  %p815_p4 = pmov %p814_p11 }
  0x54   : > { %vm173_vm0 = vcmask 3072   ;;  %v560_v0 = vmov 0.0   ;;  %v738_v1 = vld [vmem:[%s148_s28] sm:$0xff]  ;;  %vm180_vm1 = vcmask 1043456   ;;  %v190_v14 = vld [vmem:[#allocation6] sm:$0xf]  ;;  %v237_v41 = vlaneseq }
  0x55   : > { %537 = vsyncadd (%p815_p4), [#allocation7], 4294967232  ;;  %174 = vst.msk [vmem:[#allocation2] sm:$0xf] %vm173_vm0, %v560_v0  ;;  %v176_v2 = vmul.f32 %v738_v1, %v738_v1  ;;  %s561_s15 = smov 1   ;;  %s562_s17 = smov 127  }
  0x56   : > { %s563_s19 = smov 126   ;;  %v564_v32 = vmov 0   ;;  %v565_v39 = vmov 839922192   ;;  %v238_v43 = vshrl.u32 %v237_v41, 7  ;;  %s356_s24 = sshll.u32 %s603_s13, 7 }
  0x57   : > { %v178_v3 = vcombine.high %v176_v2, %v176_v2  ;;  %v181_v4 = vsel %vm180_vm1, %v176_v2, 0.0  ;;  %420 = vset.pattern.permute.xlu1 %v564_v32  ;;  %421 = vset.pattern.permute.xlu0 %v564_v32  ;;  %v235_v40 = vunpack.c.l.s4 %v565_v39  ;;  %s172_s26 = scalar_lea.vmem [#allocation8], %s347_s25  ;;  %s751_s3 = scalar_lea.hbm %s797_s2, %s356_s24 }
  0x58   : > { %s259_s27 = sshll.u32 %s172_s26, 4  ;;  %s245_s4 = scalar_lea.sflag [#allocation5], %s723_s22  ;;  %s753_s27 = int_to_ptr.vmem [resolvable:$true] %s259_s27 }
  0x59   : > { %v182_v5 = vsel %vm180_vm1, %v178_v3, 0.0  ;;  %v236_v42 = vunpack.c.0.s8 %v235_v40  ;;  %s486_s5 = scalar_lea.vmem %s753_s27, 128  ;;  %s566_s13 = smov [#allocation8]  }
  0x5a   : > { %v183_v6 = vadd.f32 %v182_v5, %v181_v4  ;;  %p487_p6 = scmp.ne.s32.totalorder %s753_s27, %s486_s5  ;;  %s490_s6 = sshll.u32 %s566_s13, 4  ;;  %s491_s6 = int_to_ptr.vmem [resolvable:$false] %s490_s6 }
  0x5b   : > { %v239_v44 = vsub.s32 %v236_v42, %v238_v43  ;;  %s492_s14 = scalar_lea.vmem %s491_s6, 256  ;;  %p493_p13 = scmp.lt.s32.totalorder %s753_s27, %s491_s6 }
  0x5c   : > { %184 = vadd.xlane.f32.xlu0 %v183_v6  ;;  %v186_v7 = vld [vmem:[#allocation2] sm:$0xf]  ;;  %p488_p9 = pnand %p487_p6, %p674_p8  ;;  %p494_p0 = scmp.lt.s32.totalorder %s492_s14, %s486_s5 }
  0x5e   : > { %p489_p12 = pneg %p488_p9  ;;  %p495_p5 = por %p494_p0, %p493_p13 }
  0x60   : > { %p496_p10 = pnand %p495_p5, %p489_p12 }
  0xe9   : > { %v185_v8 = vpop.xlane.xlu0 %184 }
  0xea   : > { %v187_v9 = vadd.f32 %v186_v7, %v185_v8 }
  0xec   : > { %188 = vst.msk [vmem:[#allocation2] sm:$0xf] %vm173_vm0, %v187_v9 }
  0xf3   : > { %v189_v10 = vld [vmem:[#allocation2] sm:$0xf] }
  0xf4   : > { %v191_v11 = vadd.f32 1e-05, %v189_v10 }
  0xf6   : > { %422 = vrsqrt.f32 %v191_v11  ;;  %vm194_vm2 = vcmp.eq.f32.partialorder %v191_v11, inf  ;;  %v197_v15 = vand.u32 2147483648, %v191_v11  ;;  %vm196_vm3 = vcmp.eq.f32.partialorder %v191_v11, 0.0 }
 0x100   : > { %v423_v12 = vpop.eup %422 }
 0x101   : > { %v193_v13 = vmul.f32 %v423_v12, %v191_v11 }
 0x103   : > { %v195_v16 = vsel %vm194_vm2, %v191_v11, %v193_v13 }
 0x104   : > { %v198_v17 = vsel %vm196_vm3, %v197_v15, %v195_v16 }
 0x105   : > { %v199_v18 = vmul.f32 %v198_v17, %v190_v14 }
 0x107   : > { %v200_v19 = vmul.f32 %v199_v18, %v199_v18 }
 0x109   : > { %v201_v20 = vsel %vm173_vm0, %v200_v19, 0.0 }
 0x10a   : > { %v202_v21 = vrot.slane %v201_v20, 4 }
 0x10c   : > { %v203_v22 = vadd.f32 %v202_v21, %v201_v20 }
 0x10e   : > { %v204_v23 = vrot.slane %v203_v22, 2 }
 0x110   : > { %v205_v24 = vadd.f32 %v204_v23, %v203_v22 }
 0x112   : > { %v206_v25 = vrot.slane %v205_v24, 1 }
 0x114   : > { %v207_v26 = vadd.f32 %v206_v25, %v205_v24 }
 0x116   : > { %v209_v27 = vmul.f32 0.25, %v207_v26 }
 0x118   : > { %v210_v28 = vadd.f32 1e-05, %v209_v27 }
 0x11a   : > { %424 = vrsqrt.f32 %v210_v28 }
 0x124   : > { %v425_v29 = vpop.eup %424 }
 0x125   : > { %213 = vrot.lane.b32.xlu0 %v425_v29, %s561_s15 }
 0x197   : > { %v214_v30 = vpop.permute.xlu0 %213 }
 0x198   : > { %v216_v31 = vmul.f32 %v214_v30, %v190_v14 }
 0x19a   : > { %218 = vrot.lane.b32.xlu1 %v216_v31, %s562_s17 }
 0x19e   : > { %223 = vrot.lane.b32.xlu1 %v190_v14, %s563_s19 }
 0x20c   : > { %v219_v33 = vpop.permute.xlu1 %218 }
 0x20d   : > { %v221_v34 = vmul.f32 %v219_v33, %v199_v18 }
 0x210   : > { %v224_v35 = vpop.permute.xlu1 %223 }
 0x211   : > { %v226_v36 = vadd.f32 %v224_v35, %v221_v34 }
 0x213   : > { %426 = vtanh.f32 %v226_v36 }
 0x21d   : > { %v427_v37 = vpop.eup %426 }
 0x21e   : > { %v228_v38 = vadd.f32 1.0, %v427_v37 }
 0x220   : > { %232 = vperm.xlu1 %420, %v228_v38  }
 0x29f   : > { %v233_v45 = vpop.permute.xlu1 %232 }
 0x2a0   : > { %v240_v46 = vrot.slane %v233_v45, %v239_v44 }
 0x2a2   : > { %v242_v47 = vmul.f32 %v240_v46, %v738_v1 }
 0x2a4   : > { %243 = vst [vmem:[%s172_s26] sm:$0xff] %v242_v47 }
 0x2a5   : > { %499 = shalt.err (!%p496_p10)
}
 0x2a6   : > { %s500_s18 = scalar_lea.hbm %s751_s3, 128  ;;  %s504_s25 = scalar_lea.hbm %s797_s2, 256 }
 0x2a7   : > { %p501_p1 = scmp.ne.s32.totalorder %s751_s3, %s500_s18  ;;  %p505_p3 = scmp.lt.u32.totalorder %s751_s3, %s797_s2 }
 0x2a8   : > { %p506_p11 = scmp.lt.u32.totalorder %s504_s25, %s500_s18  ;;  %p508_p6 = scmp.lt.u32.totalorder %s500_s18, %s751_s3 }
 0x2a9   : > { %p502_p2 = pnand %p501_p1, %p674_p8 }
 0x2aa   : > { %p507_p4 = por %p506_p11, %p505_p3 }
 0x2ab   : > { %p503_p7 = pneg %p502_p2 }
 0x2ac   : > { %p509_p9 = por %p508_p6, %p507_p4 }
 0x2ae   : > { %p510_p12 = pnand %p509_p9, %p503_p7 }
 0x2b0   : > { %513 = shalt.err (!%p510_p12)
}
 0x2b1   : > { %363 = dma.vmem_to_hbm [thread:$0]  (%p674_p8), %s753_s27, 128, %s751_s3, %s245_s4  }
 0x2b2 PF: > { %s271_s15 = sand.u32 1, %s544_s9   ;;  %p816_p13 = scmp.ne.s32.totalorder %s802_s16, 0 }
 0x2b3   : > { %p817_p0 = scmp.ge.s32.totalorder %s556_s12, 2  ;;  %s272_s17 = scalar_lea.sflag [#allocation5], %s271_s15 }
 0x2b5   : > { %p374_p5 = pnand %p817_p0, %p816_p13 }
 0x2b7   : > { %539 = dma.done.wait (!%p374_p5), %s272_s17, 128  }
 0x2b8   : > { %541 = vsyncadd (!%p374_p5), %s272_s17, 4294967168  ;;  %p16_p10 = scmp.ge.s32.totalorder %s630_s20, 4   ;;  %s818_s9 = smov %s548_s10 }
 0x2b9   : > { %s819_s10 = smov %s552_s11  ;;  %s820_s11 = smov %s666_s7 }
 0x2ba   : > { %s821_s12 = smov %s630_s20  ;;  %18 = sbr.rel (!%p16_p10) target bundleno = 6 (0x6), region = 77 }
 0x2c1   :  { %277 = vsyncpa [#allocation4], 1 }
 0x2c2   :  { %279 = vsyncpa [#allocation4 + $0x1], 1 }
 0x2c3   :  { %280 = vsyncpa [#allocation7], 1 }
 0x2c4   :  { %281 = vsyncpa [#allocation5], 1 }
 0x2c5   :  { %283 = vsyncpa [#allocation5 + $0x1], 1 }

</bundles_post_ra>
